<compile_context>
chip_gen: v6e
topology: v6e:2x2x1
jax: 0.10.0
libtpu: 0.0.40
codegen_flags: <defaults>
</compile_context>

<pallas_src>
import numpy as np
import jax
import jax.numpy as jnp
from jax.experimental import pallas as pl
from jax.experimental.pallas import tpu as pltpu

LAYERS = 2
QUBITS = 6
PARAMS_PER_GATE = 3
DIM = 2 ** QUBITS          # 64 amplitudes
NPROBS = 2 ** 3            # probs over wires [0, 1, 2]
OUT_PAD = 128              # lane-dense output width (first NPROBS columns are real)


# ----------------------------------------------------------------------------
# Host-side glue: build the 64x64 unitary of StronglyEntanglingLayers
# ----------------------------------------------------------------------------
def _rot_matrix(phi, theta, omega):
    """PennyLane Rot(phi, theta, omega) = RZ(omega) RY(theta) RZ(phi)."""
    c = np.cos(theta / 2.0)
    s = np.sin(theta / 2.0)
    return np.array(
        [
            [np.exp(-0.5j * (phi + omega)) * c, -np.exp(0.5j * (phi - omega)) * s],
            [np.exp(0.5j * (omega - phi)) * s, np.exp(0.5j * (phi + omega)) * c],
        ],
        dtype=np.complex128,
    )


def _expand_single_qubit(gate2, wire, n):
    """Embed a 2x2 gate acting on `wire` (wire 0 = most significant bit)."""
    left = np.eye(2 ** wire, dtype=np.complex128)
    right = np.eye(2 ** (n - wire - 1), dtype=np.complex128)
    return np.kron(np.kron(left, gate2), right)


def _cnot_matrix(control, target, n):
    dim = 2 ** n
    m = np.zeros((dim, dim), dtype=np.complex128)
    for i in range(dim):
        cbit = (i >> (n - 1 - control)) & 1
        j = i ^ (1 << (n - 1 - target)) if cbit else i
        m[j, i] = 1.0
    return m


def build_circuit_unitary(weights_np):
    """weights_np: (LAYERS, QUBITS, 3). Returns full 64x64 complex unitary."""
    n = QUBITS
    u = np.eye(DIM, dtype=np.complex128)
    for layer in range(weights_np.shape[0]):
        for w in range(n):                       # Rot layer
            g = _rot_matrix(*weights_np[layer, w])
            u = _expand_single_qubit(g, w, n) @ u
        r = (layer % (n - 1)) + 1                # entangling CNOT ring
        for w in range(n):
            u = _cnot_matrix(w, (w + r) % n, n) @ u
    return u


def build_fused_matrices(u):
    """Fuse real/imag parts of U^T into one (64,128) matrix, and build the
    stacked + lane-padded (128,128) marginalization matrix."""
    w_fused = np.concatenate([u.T.real, u.T.imag], axis=1).astype(np.float32)  # (64,128)
    r = np.zeros((DIM, NPROBS), dtype=np.float32)
    for j in range(DIM):
        r[j, j // (DIM // NPROBS)] = 1.0          # marginalize wires 3..5
    r2 = np.concatenate([r, r], axis=0)           # (128, 8): |Re|^2 + |Im|^2
    r2_pad = np.zeros((2 * DIM, OUT_PAD), dtype=np.float32)
    r2_pad[:, :NPROBS] = r2                       # lane-dense output (zero-padded cols)
    return jnp.asarray(w_fused), jnp.asarray(r2_pad)


# ----------------------------------------------------------------------------
# Pallas kernel: fused complex matvec -> |.|^2 -> marginal reduction -> renorm
# ----------------------------------------------------------------------------
def qnn_kernel(x_ref, w_ref, r_ref, o_ref):
    x = x_ref[...]                                             # (TB, 64) raw features
    # fused complex matvec: [Re(U x) | Im(U x)] in one lane-dense MXU matmul
    ri = jnp.dot(x, w_ref[...], preferred_element_type=jnp.float32)   # (TB, 128)
    sq = ri * ri
    # marginalize over wires 3..5 (and re-add Re^2 + Im^2) via one matmul
    p = jnp.dot(sq, r_ref[...], preferred_element_type=jnp.float32)   # (TB, 128)
    # deferred AmplitudeEmbedding(normalize=True): U unitary => sum(p) == ||x||^2
    denom = jnp.sum(p, axis=-1, keepdims=True)                 # (TB, 1)
    inv = 1.0 / jnp.maximum(denom, 1e-30)                      # exact; guards padded rows
    o_ref[...] = p * inv


def _round_up(n, m):
    return ((n + m - 1) // m) * m


def qnn_forward(x, w_fused, reduce_mat, *, max_tile_b=512):
    """x: (B, C, H, W) with C*H*W == 64  ->  (B, 8) probabilities over wires [0,1,2]."""
    b = x.shape[0]
    x_flat = x.reshape(b, -1).astype(jnp.float32)              # (B, 64)
    assert x_flat.shape[1] == DIM, "AmplitudeEmbedding needs 2**6 = 64 features"

    tb = min(max_tile_b, _round_up(b, 8))                      # sublane-aligned batch tile
    b_pad = _round_up(b, tb)
    if b_pad != b:
        x_flat = jnp.pad(x_flat, ((0, b_pad - b), (0, 0)))     # zero rows -> zero probs

    out = pl.pallas_call(
        qnn_kernel,
        out_shape=jax.ShapeDtypeStruct((b_pad, OUT_PAD), jnp.float32),
        grid_spec=pltpu.PrefetchScalarGridSpec(
            num_scalar_prefetch=0,
            grid=(b_pad // tb,),
            in_specs=[
                pl.BlockSpec((tb, DIM), lambda i: (i, 0)),         # batch-tiled features
                pl.BlockSpec((DIM, 2 * DIM), lambda i: (0, 0)),    # fused U^T, resident
                pl.BlockSpec((2 * DIM, OUT_PAD), lambda i: (0, 0)),  # reduce, resident
            ],
            out_specs=pl.BlockSpec((tb, OUT_PAD), lambda i: (i, 0)),
        ),
        compiler_params=pltpu.CompilerParams(
            dimension_semantics=("parallel",),                  # megacore split on v7x
        ),
    )(x_flat, w_fused, reduce_mat)
    return out[:b, :NPROBS]


if __name__ == "__main__":
    key = jax.random.PRNGKey(0)
    k_w, k_x = jax.random.split(key)

    # deterministic "trainable" weights (qml.qnn.TorchLayer-style uniform init)
    weights = jax.random.uniform(
        k_w, (LAYERS, QUBITS, PARAMS_PER_GATE), minval=0.0, maxval=2.0 * np.pi
    )
    u = build_circuit_unitary(np.asarray(weights, dtype=np.float64))
    w_fused, reduce_mat = build_fused_matrices(u)

    # input: NCHW (2, 4, 4, 4) -> 64 amplitudes per example
    x = jax.random.normal(k_x, (2, 4, 4, 4), dtype=jnp.float32)

    probs = qnn_forward(x, w_fused, reduce_mat)
    probs = jax.block_until_ready(probs)

    # sanity 1: each row is a probability distribution over 8 outcomes
    assert probs.shape == (2, NPROBS)
    assert np.allclose(np.asarray(jnp.sum(probs, axis=-1)), 1.0, atol=1e-4)

    # sanity 2: matches the exact numpy simulation of the PennyLane circuit
    xf = np.asarray(x, dtype=np.float64).reshape(2, -1)
    xn = xf / np.linalg.norm(xf, axis=1, keepdims=True)
    amps = xn @ u.T
    ref = (np.abs(amps) ** 2).reshape(2, NPROBS, DIM // NPROBS).sum(-1)
    assert np.allclose(np.asarray(probs), ref, atol=1e-5)

    print("KERNEL_OK")
</pallas_src>

<mosaic_0001>
module attributes {stable_mosaic.version = 11 : i64} {
  func.func @qnn_kernel(%arg0: i32, %arg1: memref<8x64xf32, #tpu.memory_space<vmem>>, %arg2: memref<64x128xf32, #tpu.memory_space<vmem>>, %arg3: memref<128x128xf32, #tpu.memory_space<vmem>>, %arg4: memref<8x128xf32, #tpu.memory_space<vmem>>) attributes {dimension_semantics = [#tpu.dimension_semantics<parallel>], iteration_bounds = array<i64: 1>, scalar_prefetch = 0 : i64, scratch_operands = 0 : i64, tpu.core_type = #tpu.core_type<tc>, window_params = [{transform_indices = @transform_0, window_bounds = array<i64: 8, 64>}, {pipeline_mode = #tpu.pipeline_mode<synchronous>, transform_indices = @transform_1, window_bounds = array<i64: 64, 128>}, {pipeline_mode = #tpu.pipeline_mode<synchronous>, transform_indices = @transform_2, window_bounds = array<i64: 128, 128>}, {transform_indices = @transform_3, window_bounds = array<i64: 8, 128>}]} {
    %c0 = arith.constant 0 : index
    %c0_0 = arith.constant 0 : index
    %0 = vector.load %arg1[%c0, %c0_0] : memref<8x64xf32, #tpu.memory_space<vmem>>, vector<8x64xf32>
    %c0_1 = arith.constant 0 : index
    %c0_2 = arith.constant 0 : index
    %1 = vector.load %arg2[%c0_1, %c0_2] : memref<64x128xf32, #tpu.memory_space<vmem>>, vector<64x128xf32>
    %cst = arith.constant dense<0.000000e+00> : vector<8x128xf32>
    %2 = tpu.matmul %0, %1, %cst {dimension_numbers = #tpu.dot_dimension_numbers<[1], [0], [0], [1], [0, 0, 1, 1], [], []>} : vector<8x64xf32>, vector<64x128xf32>, vector<8x128xf32> -> vector<8x128xf32>
    %3 = arith.mulf %2, %2 : vector<8x128xf32>
    %c0_3 = arith.constant 0 : index
    %c0_4 = arith.constant 0 : index
    %4 = vector.load %arg3[%c0_3, %c0_4] : memref<128x128xf32, #tpu.memory_space<vmem>>, vector<128x128xf32>
    %cst_5 = arith.constant dense<0.000000e+00> : vector<8x128xf32>
    %5 = tpu.matmul %3, %4, %cst_5 {dimension_numbers = #tpu.dot_dimension_numbers<[1], [0], [0], [1], [0, 0, 1, 1], [], []>} : vector<8x128xf32>, vector<128x128xf32>, vector<8x128xf32> -> vector<8x128xf32>
    %cst_6 = arith.constant dense<0.000000e+00> : vector<8xf32>
    %6 = vector.multi_reduction <add>, %5, %cst_6 [1] : vector<8x128xf32> to vector<8xf32>
    %7 = vector.shape_cast %6 : vector<8xf32> to vector<8x1xf32>
    %cst_7 = arith.constant 1.000000e-30 : f32
    %8 = vector.broadcast %cst_7 : f32 to vector<8x1xf32>
    %9 = arith.maximumf %7, %8 : vector<8x1xf32>
    %cst_8 = arith.constant 1.000000e+00 : f32
    %10 = vector.broadcast %cst_8 : f32 to vector<8x1xf32>
    %11 = arith.divf %10, %9 : vector<8x1xf32>
    %12 = vector.broadcast %11 : vector<8x1xf32> to vector<8x128xf32>
    %13 = arith.mulf %5, %12 : vector<8x128xf32>
    %c0_9 = arith.constant 0 : index
    %c0_10 = arith.constant 0 : index
    %14 = vector.load %arg4[%c0_9, %c0_10] : memref<8x128xf32, #tpu.memory_space<vmem>>, vector<8x128xf32>
    tpu.vector_store %arg4[%c0_9, %c0_10], %13 {strides = array<i32>} : memref<8x128xf32, #tpu.memory_space<vmem>>, vector<8x128xf32>,
    return
  }
  func.func @transform_0(%arg0: i32) -> (i32, i32) {
    %c0_i32 = arith.constant 0 : i32
    %c0_i32_0 = arith.constant 0 : i32
    return %arg0, %c0_i32 : i32, i32
  }
  func.func @transform_1(%arg0: i32) -> (i32, i32) {
    %c0_i32 = arith.constant 0 : i32
    %c0_i32_0 = arith.constant 0 : i32
    %c0_i32_1 = arith.constant 0 : i32
    return %c0_i32, %c0_i32_0 : i32, i32
  }
  func.func @transform_2(%arg0: i32) -> (i32, i32) {
    %c0_i32 = arith.constant 0 : i32
    %c0_i32_0 = arith.constant 0 : i32
    %c0_i32_1 = arith.constant 0 : i32
    return %c0_i32, %c0_i32_0 : i32, i32
  }
  func.func @transform_3(%arg0: i32) -> (i32, i32) {
    %c0_i32 = arith.constant 0 : i32
    %c0_i32_0 = arith.constant 0 : i32
    return %arg0, %c0_i32 : i32, i32
  }
}

</mosaic_0001>

<bundles_post_ra>
// kernel: tpu_custom_call.1
= control target key start
LH: loop header
LB: loop body
LE: loop exit
PB: predicated region body
PF: predicated region fallthrough
CT: control target
= control target key end

     0   :  { %8 = vsyncpa [#allocation3], 0  ;;  %s490_s0 = inlined_call_operand.hbm [shape: f32[8,64], index: 0, kind: input, shape index: {}]   ;;  %s491_s1 = inlined_call_operand.hbm [shape: f32[64,128], index: 1, kind: input, shape index: {}]   ;;  %s492_s2 = inlined_call_operand.hbm [shape: f32[128,128], index: 2, kind: input, shape index: {}]   ;;  %s493_s3 = inlined_call_operand.hbm [shape: f32[8,128], index: 3, kind: output, shape index: {}]  }
   0x1   :  { %9 = vsyncpa [#allocation6], 0 }
   0x2   :  { %10 = vsyncpa [#allocation4], 0  ;;  %s424_s12 = smov [#allocation5]  }
   0x3   :  { %s26_s13 = sshll.u32 %s424_s12, 4  ;;  %s27_s13 = int_to_ptr.vmem [resolvable:$true] %s26_s13 }
   0x4   :  { %s346_s14 = scalar_lea.vmem %s27_s13, 1024  ;;  %p351_p1 = scmp.lt.s32.totalorder %s27_s13, %s27_s13 }
   0x5   :  { %p347_p0 = scmp.ne.s32.totalorder %s27_s13, %s346_s14  ;;  %p352_p2 = scmp.lt.s32.totalorder %s346_s14, %s346_s14 }
   0x7   :  { %p353_p3 = por %p352_p2, %p351_p1 }
   0x9   :  { %p354_p4 = pnand %p353_p3, %p347_p0 }
   0xb   :  { %357 = shalt.err (!%p354_p4)
}
   0xc   :  { %s425_s15 = smov 128   ;;  %s426_s16 = smov 8  }
   0xd   :  { %32 = dma.hbm_to_vmem [thread:$0]  %s491_s1, 1024, %s27_s13, [#allocation6], %s425_s15, %s425_s15, %s426_s16  }
   0xe   :  { %s427_s19 = smov [#allocation2]   ;;  %s428_s21 = smov [#allocation7]  }
   0xf   :  { %s17_s20 = sshll.u32 %s427_s19, 4  ;;  %s38_s22 = sshll.u32 %s428_s21, 4  ;;  %s18_s20 = int_to_ptr.vmem [resolvable:$true] %s17_s20  ;;  %s39_s22 = int_to_ptr.vmem [resolvable:$true] %s38_s22 }
  0x10   :  { %s366_s23 = scalar_lea.vmem %s18_s20, 128  ;;  %p371_p6 = scmp.lt.s32.totalorder %s18_s20, %s18_s20 }
  0x11   :  { %p367_p5 = scmp.ne.s32.totalorder %s18_s20, %s366_s23  ;;  %p372_p7 = scmp.lt.s32.totalorder %s366_s23, %s366_s23 }
  0x13   :  { %p373_p8 = por %p372_p7, %p371_p6 }
  0x15   :  { %p374_p9 = pnand %p373_p8, %p367_p5 }
  0x17   :  { %377 = shalt.err (!%p374_p9)
}
  0x18   :  { %20 = dma.hbm_to_vmem [thread:$0]  %s490_s0, 128, %s18_s20, [#allocation3]  }
  0x19   :  { %s386_s26 = scalar_lea.vmem %s39_s22, 2048  ;;  %p391_p11 = scmp.lt.s32.totalorder %s39_s22, %s39_s22 }
  0x1a   :  { %p387_p10 = scmp.ne.s32.totalorder %s39_s22, %s386_s26  ;;  %p392_p12 = scmp.lt.s32.totalorder %s386_s26, %s386_s26 }
  0x1c   :  { %p393_p13 = por %p392_p12, %p391_p11 }
  0x1e   :  { %p394_p0 = pnand %p393_p13, %p387_p10 }
  0x20   :  { %397 = shalt.err (!%p394_p0)
}
  0x21   :  { %44 = dma.hbm_to_vmem [thread:$0]  %s492_s2, 2048, %s39_s22, [#allocation6], %s425_s15, %s425_s15, %s426_s16  }
  0x22   :  { %418 = dma.done.wait [#allocation3], 128  }
  0x23   :  { %419 = vsyncadd [#allocation3], 4294967168 }
  0x24   :  { %420 = dma.done.wait [#allocation6], 3072  }
  0x25   :  { %421 = vsyncadd [#allocation6], 4294964224  ;;  %v429_v0 = vmov 0.0   ;;  %vm430_vm0 = vmmov 0   ;;  %v62_v1 = vld [vmem:[#allocation5 + $0x38] sm:$0xff]  ;;  %v61_v2 = vld [vmem:[#allocation5 + $0x30] sm:$0xff] }
  0x26   :  { %274 = vmatprep.subr.mxu0 %v429_v0  ;;  %290 = vmatprep.mubr.msk.f32.mxu0 %vm430_vm0, %v429_v0  ;;  %v60_v3 = vld [vmem:[#allocation5 + $0x28] sm:$0xff]  ;;  %v153_v4 = vld [vmem:[#allocation7 + $0x78] sm:$0xff]  ;;  %v152_v5 = vld [vmem:[#allocation7 + $0x70] sm:$0xff]  ;;  %vm63_vm1 = vcmask 523264   ;;  %s431_s0 = smov [#allocation8]  }
  0x27   :  { %293 = vmatprep.subr.mxu1 %v429_v0  ;;  %325 = vmatprep.mubr.msk.f32.mxu1 %vm430_vm0, %v429_v0  ;;  %v59_v6 = vld [vmem:[#allocation5 + $0x20] sm:$0xff]  ;;  %v151_v7 = vld [vmem:[#allocation7 + $0x68] sm:$0xff]  ;;  %v58_v8 = vld [vmem:[#allocation5 + $0x18] sm:$0xff]  ;;  %s237_s2 = sshll.u32 %s431_s0, 4  ;;  %s238_s2 = int_to_ptr.vmem [resolvable:$true] %s237_s2 }
  0x28   :  { %275 = vmatpush3.msra.mxu0 %v62_v1  ;;  %294 = vmatpush3.msra.mxu1 %v153_v4  ;;  %v150_v9 = vld [vmem:[#allocation7 + $0x60] sm:$0xff]  ;;  %v57_v10 = vld [vmem:[#allocation5 + $0x10] sm:$0xff]  ;;  %v149_v11 = vld [vmem:[#allocation7 + $0x58] sm:$0xff]  ;;  %s398_s28 = scalar_lea.vmem %s238_s2, 128  ;;  %p403_p2 = scmp.lt.s32.totalorder %s238_s2, %s238_s2 }
  0x29   :  { %276 = vmatprep.subr.mxu0 %v429_v0  ;;  %295 = vmatprep.subr.mxu1 %v429_v0  ;;  %v56_v12 = vld [vmem:[#allocation5 + $0x8] sm:$0xff]  ;;  %v148_v13 = vld [vmem:[#allocation7 + $0x50] sm:$0xff]  ;;  %v55_v14 = vld [vmem:[#allocation5] sm:$0xff]  ;;  %p399_p1 = scmp.ne.s32.totalorder %s238_s2, %s398_s28  ;;  %p404_p3 = scmp.lt.s32.totalorder %s398_s28, %s398_s28 }
  0x2a   :  { %277 = vmatpush3.msra.mxu0 %v61_v2  ;;  %296 = vmatpush3.msra.mxu1 %v152_v5  ;;  %v54_v15 = vld [vmem:[#allocation2] sm:$0xff]  ;;  %v147_v16 = vld [vmem:[#allocation7 + $0x48] sm:$0xff]  ;;  %v146_v17 = vld [vmem:[#allocation7 + $0x40] sm:$0xff] }
  0x2b   :  { %278 = vmatprep.subr.mxu0 %v429_v0  ;;  %297 = vmatprep.subr.mxu1 %v429_v0  ;;  %v145_v18 = vld [vmem:[#allocation7 + $0x38] sm:$0xff]  ;;  %v144_v19 = vld [vmem:[#allocation7 + $0x30] sm:$0xff]  ;;  %v143_v20 = vld [vmem:[#allocation7 + $0x28] sm:$0xff]  ;;  %p405_p4 = por %p404_p3, %p403_p2 }
  0x2c   :  { %279 = vmatpush3.msra.mxu0 %v60_v3  ;;  %298 = vmatpush3.msra.mxu1 %v151_v7  ;;  %v142_v21 = vld [vmem:[#allocation7 + $0x20] sm:$0xff]  ;;  %v141_v22 = vld [vmem:[#allocation7 + $0x18] sm:$0xff]  ;;  %v140_v23 = vld [vmem:[#allocation7 + $0x10] sm:$0xff] }
  0x2d   :  { %280 = vmatprep.subr.mxu0 %v429_v0  ;;  %299 = vmatprep.subr.mxu1 %v429_v0  ;;  %v139_v24 = vld [vmem:[#allocation7 + $0x8] sm:$0xff]  ;;  %v138_v25 = vld [vmem:[#allocation7] sm:$0xff]  ;;  %p406_p5 = pnand %p405_p4, %p399_p1 }
  0x2e   :  { %281 = vmatpush3.msra.mxu0 %v59_v6  ;;  %300 = vmatpush3.msra.mxu1 %v150_v9 }
  0x2f   :  { %282 = vmatprep.subr.mxu0 %v429_v0  ;;  %301 = vmatprep.subr.mxu1 %v429_v0 }
  0x30   :  { %283 = vmatpush3.msra.mxu0 %v58_v8  ;;  %302 = vmatpush3.msra.mxu1 %v149_v11 }
  0x31   :  { %284 = vmatprep.subr.mxu0 %v429_v0  ;;  %303 = vmatprep.subr.mxu1 %v429_v0 }
  0x32   :  { %285 = vmatpush3.msra.mxu0 %v57_v10  ;;  %304 = vmatpush3.msra.mxu1 %v148_v13 }
  0x33   :  { %286 = vmatprep.subr.mxu0 %v429_v0  ;;  %305 = vmatprep.subr.mxu1 %v429_v0 }
  0x34   :  { %287 = vmatpush3.msra.mxu0 %v56_v12  ;;  %306 = vmatpush3.msra.mxu1 %v147_v16 }
  0x35   :  { %288 = vmatprep.subr.mxu0 %v429_v0  ;;  %307 = vmatprep.subr.mxu1 %v429_v0 }
  0x36   :  { %289 = vmatpush3.msra.mxu0 %v55_v14  ;;  %308 = vmatpush3.msra.mxu1 %v146_v17 }
  0x37   :  { %291 = vmatmul.mubr.msk.f32.vlgmr.msra.gmra.mxu0 %vm63_vm1, %v54_v15  ;;  %309 = vmatprep.subr.mxu1 %v429_v0 }
  0x38   :  { %310 = vmatpush3.msra.mxu1 %v145_v18 }
  0x39   :  { %311 = vmatprep.subr.mxu1 %v429_v0 }
  0x3a   :  { %312 = vmatpush3.msra.mxu1 %v144_v19 }
  0x3b   :  { %313 = vmatprep.subr.mxu1 %v429_v0 }
  0x3c   :  { %314 = vmatpush3.msra.mxu1 %v143_v20 }
  0x3d   :  { %315 = vmatprep.subr.mxu1 %v429_v0 }
  0x3e   :  { %316 = vmatpush3.msra.mxu1 %v142_v21 }
  0x3f   :  { %317 = vmatprep.subr.mxu1 %v429_v0 }
  0x40   :  { %318 = vmatpush3.msra.mxu1 %v141_v22 }
  0x41   :  { %319 = vmatprep.subr.mxu1 %v429_v0 }
  0x42   :  { %320 = vmatpush3.msra.mxu1 %v140_v23 }
  0x43   :  { %321 = vmatprep.subr.mxu1 %v429_v0 }
  0x44   :  { %322 = vmatpush3.msra.mxu1 %v139_v24 }
  0x45   :  { %323 = vmatprep.subr.mxu1 %v429_v0 }
  0x46   :  { %324 = vmatpush3.msra.mxu1 %v138_v25 }
  0xf7   :  { %v133_v26 = vpop.f32.mrf.mxu0 }
  0xf8   :  { %v137_v27 = vmul.f32 %v133_v26, %v133_v26 }
  0xf9   :  { %v292_v28 = vpop.f32.mrf.mxu0 }
  0xfa   :  { %326 = vmatmul.mubr.f32.vlgmr.msra.gmra.mxu1 %v137_v27 }
 0x1ba   :  { %v220_v29 = vpop.f32.mrf.mxu1 }
 0x1bb   :  { %224 = vadd.xlane.f32.xlu0 %v220_v29 }
 0x1bc   :  { %v327_v30 = vpop.f32.mrf.mxu1 }
 0x244   :  { %v225_v31 = vpop.xlane.xlu0 %224 }
 0x245   :  { %v226_v32 = vmax.f32 %v225_v31, 1e-30 }
 0x247   :  { %336 = vrcp.f32 %v226_v32 }
 0x254   :  { %v337_v33 = vpop.eup %336 }
 0x255   :  { %v229_v34 = vmul.f32 %v337_v33, %v220_v29 }
 0x257   :  { %230 = vst [vmem:[#allocation8] sm:$0xff] %v229_v34 }
 0x258   :  { %409 = shalt.err (!%p406_p5)
}
 0x259   :  { %240 = dma.vmem_to_hbm [thread:$0]  %s238_s2, 128, %s493_s3, [#allocation4]  }
 0x25a   :  { %422 = dma.done.wait [#allocation4], 128  }
 0x25b   :  { %423 = vsyncadd [#allocation4], 4294967168 }
 0x25c   :  { %244 = vsyncpa [#allocation3], 1 }
 0x25d   :  { %245 = vsyncpa [#allocation6], 1 }
 0x25e   :  { %246 = vsyncpa [#allocation4], 1 }

</bundles_post_ra>
